<compile_context>
chip_gen: v7x
topology: tpu7x:2x2x1
jax: 0.10.0
libtpu: 0.0.40
codegen_flags: <defaults>
</compile_context>

<pallas_src>
import jax
import jax.numpy as jnp
from jax.experimental import pallas as pl
from jax.experimental.pallas import tpu as pltpu


def _baseline_kernel(hist_ref, w_ref, out_ref):
    # hist_ref: (3, B*C, L) f32 — plane 0 = close, 1 = high, 2 = low
    # w_ref:    (4, B*C, H*Q) f32 — softmax weights (close, recent, high, low)
    # out_ref:  (B*C, H*Q) f32
    close = hist_ref[0]                                    # (BC, L)
    high = hist_ref[1]                                     # (BC, L)
    low = hist_ref[2]                                      # (BC, L)
    L = close.shape[-1]

    # Lookback reductions along the lane axis (XLU reduces), keepdims for
    # a cheap lane-broadcast in the combine below.
    close_mean = jnp.mean(close, axis=-1, keepdims=True)   # (BC, 1)
    recent = close[:, L - 1:L]                             # (BC, 1) last close
    hi = jnp.max(high, axis=-1, keepdims=True)             # (BC, 1)
    lo = jnp.min(low, axis=-1, keepdims=True)              # (BC, 1)
    # NOTE: PyTorch also computes `overall_price_mean` but never uses it in
    # the returned value, so it is intentionally not materialized.

    out_ref[...] = (w_ref[0] * close_mean
                    + w_ref[1] * recent
                    + w_ref[2] * hi
                    + w_ref[3] * lo)


def baseline_forward(historical_data, price_mixture_logits):
    """historical_data: (B, C, L, F) f32; price_mixture_logits: (C, H, Q, 4) f32."""
    B, C, L, F = historical_data.shape
    Cc, H, Q, K = price_mixture_logits.shape
    assert Cc == C and K == 4
    # Feature layout assumption: ['Open', 'High', 'Low', 'Close', ...]
    assert F >= 4, "expected at least 4 historical features (O, H, L, C, ...)"

    BC, HQ = B * C, H * Q
    dtype = historical_data.dtype

    # ---- layout plumbing in the wrapper (fused by XLA, not the hot path) ----
    # Put lookback L on lanes; pick only the features the kernel needs.
    hist_bc = historical_data.reshape(BC, L, F)
    hist_planes = jnp.stack(
        [hist_bc[:, :, 3], hist_bc[:, :, 1], hist_bc[:, :, 2]], axis=0
    ).astype(dtype)                                          # (3, BC, L)

    # Parameter-only softmax hoisted out of the kernel; transpose the mixture
    # axis to the front and tile across batch so the kernel is pure elementwise.
    w = jax.nn.softmax(price_mixture_logits.astype(jnp.float32), axis=-1)
    w = jnp.moveaxis(w, -1, 0).reshape(4, 1, C, HQ)          # (4, 1, C, HQ)
    w_planes = jnp.broadcast_to(w, (4, B, C, HQ)).reshape(4, BC, HQ).astype(dtype)

    out_flat = pl.pallas_call(
        _baseline_kernel,
        out_shape=jax.ShapeDtypeStruct((BC, HQ), dtype),
        in_specs=[
            pl.BlockSpec(memory_space=pltpu.MemorySpace.VMEM),
            pl.BlockSpec(memory_space=pltpu.MemorySpace.VMEM),
        ],
        out_specs=pl.BlockSpec(memory_space=pltpu.MemorySpace.VMEM),
        cost_estimate=pl.CostEstimate(
            flops=BC * (3 * L + 8 * HQ),
            transcendentals=0,
            bytes_accessed=4 * (3 * BC * L + 4 * BC * HQ + BC * HQ),
        ),
    )(hist_planes, w_planes)

    return out_flat.reshape(B, C, H, Q)


def reference_forward(hist, logits):
    """Pure-JAX reference mirroring the PyTorch forward."""
    close_mean = hist[:, :, :, 3].mean(axis=2)
    recent = hist[:, :, -1, 3]
    high = hist[:, :, :, 1].max(axis=2)
    low = hist[:, :, :, 2].min(axis=2)
    w = jax.nn.softmax(logits, axis=-1)
    wc, wr, wh, wl = w[..., 0], w[..., 1], w[..., 2], w[..., 3]
    return (wc[None] * close_mean[:, :, None, None]
            + wr[None] * recent[:, :, None, None]
            + wh[None] * high[:, :, None, None]
            + wl[None] * low[:, :, None, None])


if __name__ == "__main__":
    # Small config consistent with the module:
    # num_historical_features=6, num_time_features=5 (unused by forward),
    # num_channels=4, lookback=16, horizon=8, quantiles=[0.1, 0.5, 0.9]
    B = 2        # batch
    C = 4        # num_channels
    L = 16       # lookback
    F = 6        # num_historical_features
    H = 8        # horizon
    Q = 3        # len(output_quantiles)

    key = jax.random.PRNGKey(0)
    k_hist, k_logits = jax.random.split(key)

    historical_data = jax.random.normal(k_hist, (B, C, L, F), dtype=jnp.float32)
    # Deterministic parameter init (stands in for torch.randn in __init__).
    price_mixture_logits = jax.random.normal(k_logits, (C, H, Q, 4), dtype=jnp.float32)

    out = baseline_forward(historical_data, price_mixture_logits)
    out = jax.block_until_ready(out)

    ref = reference_forward(historical_data, price_mixture_logits)
    assert out.shape == (B, C, H, Q)
    assert jnp.allclose(out, ref, atol=1e-5, rtol=1e-5), "mismatch vs reference"

    print("KERNEL_OK")
</pallas_src>

<mosaic_0001>
module attributes {stable_mosaic.version = 11 : i64} {
  func.func @_baseline_kernel(%arg0: memref<3x8x16xf32, #tpu.memory_space<vmem>>, %arg1: memref<4x8x24xf32, #tpu.memory_space<vmem>>, %arg2: memref<8x24xf32, #tpu.memory_space<vmem>>) attributes {dimension_semantics = [], scalar_prefetch = 0 : i64, scratch_operands = 0 : i64, tpu.core_type = #tpu.core_type<tc>} {
    %c0 = arith.constant 0 : index
    %c0_0 = arith.constant 0 : index
    %c0_1 = arith.constant 0 : index
    %0 = vector.load %arg0[%c0, %c0_0, %c0_1] : memref<3x8x16xf32, #tpu.memory_space<vmem>>, vector<1x8x16xf32>
    %1 = vector.shape_cast %0 : vector<1x8x16xf32> to vector<8x16xf32>
    %c1 = arith.constant 1 : index
    %c0_2 = arith.constant 0 : index
    %c0_3 = arith.constant 0 : index
    %2 = vector.load %arg0[%c1, %c0_2, %c0_3] : memref<3x8x16xf32, #tpu.memory_space<vmem>>, vector<1x8x16xf32>
    %3 = vector.shape_cast %2 : vector<1x8x16xf32> to vector<8x16xf32>
    %c2 = arith.constant 2 : index
    %c0_4 = arith.constant 0 : index
    %c0_5 = arith.constant 0 : index
    %4 = vector.load %arg0[%c2, %c0_4, %c0_5] : memref<3x8x16xf32, #tpu.memory_space<vmem>>, vector<1x8x16xf32>
    %5 = vector.shape_cast %4 : vector<1x8x16xf32> to vector<8x16xf32>
    %cst = arith.constant dense<0.000000e+00> : vector<8xf32>
    %6 = vector.multi_reduction <add>, %1, %cst [1] : vector<8x16xf32> to vector<8xf32>
    %7 = vector.shape_cast %6 : vector<8xf32> to vector<8x1xf32>
    %cst_6 = arith.constant 1.600000e+01 : f32
    %8 = vector.broadcast %cst_6 : f32 to vector<8x1xf32>
    %9 = arith.divf %7, %8 : vector<8x1xf32>
    %10 = vector.extract_strided_slice %1 {offsets = [0, 15], sizes = [8, 1], strides = [1, 1]} : vector<8x16xf32> to vector<8x1xf32>
    %cst_7 = arith.constant dense<0xFF800000> : vector<8xf32>
    %11 = vector.multi_reduction <maximumf>, %3, %cst_7 [1] : vector<8x16xf32> to vector<8xf32>
    %12 = vector.shape_cast %11 : vector<8xf32> to vector<8x1xf32>
    %cst_8 = arith.constant dense<0x7F800000> : vector<8xf32>
    %13 = vector.multi_reduction <minimumf>, %5, %cst_8 [1] : vector<8x16xf32> to vector<8xf32>
    %14 = vector.shape_cast %13 : vector<8xf32> to vector<8x1xf32>
    %c0_9 = arith.constant 0 : index
    %c0_10 = arith.constant 0 : index
    %c0_11 = arith.constant 0 : index
    %15 = vector.load %arg1[%c0_9, %c0_10, %c0_11] : memref<4x8x24xf32, #tpu.memory_space<vmem>>, vector<1x8x24xf32>
    %16 = vector.shape_cast %15 : vector<1x8x24xf32> to vector<8x24xf32>
    %17 = vector.broadcast %9 : vector<8x1xf32> to vector<8x24xf32>
    %18 = arith.mulf %16, %17 : vector<8x24xf32>
    %c1_12 = arith.constant 1 : index
    %c0_13 = arith.constant 0 : index
    %c0_14 = arith.constant 0 : index
    %19 = vector.load %arg1[%c1_12, %c0_13, %c0_14] : memref<4x8x24xf32, #tpu.memory_space<vmem>>, vector<1x8x24xf32>
    %20 = vector.shape_cast %19 : vector<1x8x24xf32> to vector<8x24xf32>
    %21 = vector.broadcast %10 : vector<8x1xf32> to vector<8x24xf32>
    %22 = arith.mulf %20, %21 : vector<8x24xf32>
    %23 = arith.addf %18, %22 : vector<8x24xf32>
    %c2_15 = arith.constant 2 : index
    %c0_16 = arith.constant 0 : index
    %c0_17 = arith.constant 0 : index
    %24 = vector.load %arg1[%c2_15, %c0_16, %c0_17] : memref<4x8x24xf32, #tpu.memory_space<vmem>>, vector<1x8x24xf32>
    %25 = vector.shape_cast %24 : vector<1x8x24xf32> to vector<8x24xf32>
    %26 = vector.broadcast %12 : vector<8x1xf32> to vector<8x24xf32>
    %27 = arith.mulf %25, %26 : vector<8x24xf32>
    %28 = arith.addf %23, %27 : vector<8x24xf32>
    %c3 = arith.constant 3 : index
    %c0_18 = arith.constant 0 : index
    %c0_19 = arith.constant 0 : index
    %29 = vector.load %arg1[%c3, %c0_18, %c0_19] : memref<4x8x24xf32, #tpu.memory_space<vmem>>, vector<1x8x24xf32>
    %30 = vector.shape_cast %29 : vector<1x8x24xf32> to vector<8x24xf32>
    %31 = vector.broadcast %14 : vector<8x1xf32> to vector<8x24xf32>
    %32 = arith.mulf %30, %31 : vector<8x24xf32>
    %33 = arith.addf %28, %32 : vector<8x24xf32>
    %c0_20 = arith.constant 0 : index
    %c0_21 = arith.constant 0 : index
    %34 = vector.load %arg2[%c0_20, %c0_21] : memref<8x24xf32, #tpu.memory_space<vmem>>, vector<8x24xf32>
    tpu.vector_store %arg2[%c0_20, %c0_21], %33 {strides = array<i32>} : memref<8x24xf32, #tpu.memory_space<vmem>>, vector<8x24xf32>,
    return
  }
}

</mosaic_0001>

<bundles_post_ra>
// kernel: tpu_custom_call.1
= control target key start
LH: loop header
LB: loop body
LE: loop exit
PB: predicated region body
PF: predicated region fallthrough
CT: control target
= control target key end

     0   :  { %7 = vsyncpa [#allocation3], 0  ;;  %s231_s0 = inlined_call_operand.hbm [shape: f32[3,8,16], index: 0, kind: input, shape index: {}]   ;;  %s232_s1 = inlined_call_operand.hbm [shape: f32[4,8,24], index: 1, kind: input, shape index: {}]   ;;  %s233_s2 = inlined_call_operand.hbm [shape: f32[8,24], index: 2, kind: output, shape index: {}]  }
   0x1   :  { %8 = vsyncpa [#allocation6], 0 }
   0x2   :  { %9 = vsyncpa [#allocation4], 0  ;;  %s174_s9 = smov [#allocation2]   ;;  %s102_s13 = scalar_lea.hbm %s231_s0, 384 }
   0x3   :  { %s15_s10 = sshll.u32 %s174_s9, 4  ;;  %p103_p0 = scmp.ne.s32.totalorder %s231_s0, %s102_s13  ;;  %s16_s10 = int_to_ptr.vmem [resolvable:$true] %s15_s10 }
   0x4   :  { %p106_p1 = scmp.lt.u32.totalorder %s102_s13, %s231_s0 }
   0x6   :  { %p108_p2 = pnand %p106_p1, %p103_p0 }
   0x8   :  { %111 = shalt.err (!%p108_p2)
}
   0x9   :  { %s112_s18 = scalar_lea.vmem %s16_s10, 384  ;;  %p117_p4 = scmp.lt.s32.totalorder %s16_s10, %s16_s10 }
   0xa   :  { %p113_p3 = scmp.ne.s32.totalorder %s16_s10, %s112_s18  ;;  %p118_p5 = scmp.lt.s32.totalorder %s112_s18, %s112_s18 }
   0xc   :  { %p119_p6 = por %p118_p5, %p117_p4 }
   0xe   :  { %p120_p7 = pnand %p119_p6, %p113_p3 }
  0x10   :  { %123 = shalt.err (!%p120_p7)
}
  0x11   :  { %s175_s19 = smov 128   ;;  %s176_s20 = smov 8  }
  0x12   :  { %21 = dma.hbm_to_vmem [thread:$0]  %s231_s0, 384, %s16_s10, [#allocation3], %s175_s19, %s175_s19, %s176_s20  }
  0x13   :  { %s177_s23 = smov [#allocation5]   ;;  %s124_s27 = scalar_lea.hbm %s232_s1, 512 }
  0x14   :  { %s27_s24 = sshll.u32 %s177_s23, 4  ;;  %p125_p8 = scmp.ne.s32.totalorder %s232_s1, %s124_s27  ;;  %s28_s24 = int_to_ptr.vmem [resolvable:$true] %s27_s24 }
  0x15   :  { %p128_p9 = scmp.lt.u32.totalorder %s124_s27, %s232_s1 }
  0x17   :  { %p130_p10 = pnand %p128_p9, %p125_p8 }
  0x19   :  { %133 = shalt.err (!%p130_p10)
}
  0x1a   :  { %s134_s4 = scalar_lea.vmem %s28_s24, 512  ;;  %p139_p12 = scmp.lt.s32.totalorder %s28_s24, %s28_s24 }
  0x1b   :  { %p135_p11 = scmp.ne.s32.totalorder %s28_s24, %s134_s4  ;;  %p140_p13 = scmp.lt.s32.totalorder %s134_s4, %s134_s4 }
  0x1d   :  { %p141_p0 = por %p140_p13, %p139_p12 }
  0x1f   :  { %p142_p1 = pnand %p141_p0, %p135_p11 }
  0x21   :  { %145 = shalt.err (!%p142_p1)
}
  0x22   :  { %33 = dma.hbm_to_vmem [thread:$0]  %s232_s1, 512, %s28_s24, [#allocation6], %s175_s19, %s175_s19, %s176_s20  }
  0x23   :  { %168 = dma.done.wait [#allocation3], 384  }
  0x24   :  { %169 = vsyncadd [#allocation3], 4294966912 }
  0x25   :  { %170 = dma.done.wait [#allocation6], 512  }
  0x26   :  { %171 = vsyncadd [#allocation6], 4294966784  ;;  %v178_v0 = vmov 15   ;;  %vm45_vm0 = vcmask 130048   ;;  %v44_v1 = vld [vmem:[#allocation2 + $0x10] sm:$0xff]  ;;  %v40_v2 = vld [vmem:[#allocation2] sm:$0xff] }
  0x27   :  { %100 = vset.pattern.permute.xlu1 %v178_v0  ;;  %101 = vset.pattern.permute.xlu0 %v178_v0  ;;  %v42_v3 = vld [vmem:[#allocation2 + $0x8] sm:$0xff]  ;;  %v54_v4 = vsel %vm45_vm0, %v44_v1, inf  ;;  %v46_v5 = vsel %vm45_vm0, %v40_v2, 0.0  ;;  %v57_v8 = vld [vmem:[#allocation5] sm:$0xff]  ;;  %v60_v11 = vld [vmem:[#allocation5 + $0x8] sm:$0xff]  ;;  %s179_s1 = smov [#allocation7]  }
  0x28   :  { %55 = vmin.xlane.f32.xlu1 %v54_v4  ;;  %47 = vadd.xlane.f32.xlu0 %v46_v5  ;;  %v51_v6 = vsel %vm45_vm0, %v42_v3, -inf  ;;  %v69_v12 = vld [vmem:[#allocation5 + $0x10] sm:$0xff]  ;;  %v73_v18 = vld [vmem:[#allocation5 + $0x18] sm:$0xff]  ;;  %s84_s6 = sshll.u32 %s179_s1, 4  ;;  %vm76_vm1 = vcmask 195584   ;;  %s85_s6 = int_to_ptr.vmem [resolvable:$true] %s84_s6 }
  0x29   :  { %s146_s7 = scalar_lea.vmem %s85_s6, 128  ;;  %p151_p3 = scmp.lt.s32.totalorder %s85_s6, %s85_s6 }
  0x2a   :  { %p147_p2 = scmp.ne.s32.totalorder %s85_s6, %s146_s7  ;;  %p152_p4 = scmp.lt.s32.totalorder %s146_s7, %s146_s7 }
  0x2c   :  { %52 = vmax.xlane.f32.xlu0 %v51_v6  ;;  %p153_p5 = por %p152_p4, %p151_p3 }
  0x2e   :  { %p154_p6 = pnand %p153_p5, %p147_p2 }
  0x39   :  { %63 = vperm.xlu1 %100, %v40_v2  }
  0xb5   :  { %v56_v7 = vpop.xlane.xlu1 %55  ;;  %v48_v9 = vpop.xlane.xlu0 %47 }
  0xb6   :  { %v50_v10 = vmul.f32 0.0625, %v48_v9  ;;  %v74_v20 = vmul.f32 %v73_v18, %v56_v7 }
  0xb8   :  { %v58_v13 = vmul.f32 %v57_v8, %v50_v10 }
  0xb9   :  { %v64_v14 = vpop.permute.xlu1 %63  ;;  %v53_v15 = vpop.xlane.xlu0 %52 }
  0xba   :  { %v66_v16 = vmul.f32 %v64_v14, %v60_v11  ;;  %v70_v17 = vmul.f32 %v69_v12, %v53_v15 }
  0xbc   :  { %v67_v19 = vadd.f32 %v66_v16, %v58_v13 }
  0xbe   :  { %v71_v21 = vadd.f32 %v70_v17, %v67_v19 }
  0xc0   :  { %v75_v22 = vadd.f32 %v74_v20, %v71_v21 }
  0xc2   :  { %77 = vst.msk [vmem:[#allocation7] sm:$0xff] %vm76_vm1, %v75_v22 }
  0xc3   :  { %157 = shalt.err (!%p154_p6)
}
  0xc4   :  { %s158_s10 = scalar_lea.hbm %s233_s2, 128 }
  0xc5   :  { %p159_p7 = scmp.ne.s32.totalorder %s233_s2, %s158_s10  ;;  %p162_p8 = scmp.lt.u32.totalorder %s158_s10, %s233_s2 }
  0xc7   :  { %p164_p9 = pnand %p162_p8, %p159_p7 }
  0xc9   :  { %167 = shalt.err (!%p164_p9)
}
  0xca   :  { %87 = dma.vmem_to_hbm [thread:$0]  %s85_s6, 128, %s233_s2, [#allocation4]  }
  0xcb   :  { %172 = dma.done.wait [#allocation4], 128  }
  0xcc   :  { %173 = vsyncadd [#allocation4], 4294967168 }
  0xcd   :  { %91 = vsyncpa [#allocation3], 1 }
  0xce   :  { %92 = vsyncpa [#allocation6], 1 }
  0xcf   :  { %93 = vsyncpa [#allocation4], 1 }

</bundles_post_ra>
